<compile_context>
chip_gen: v7x
topology: tpu7x:2x2x1
jax: 0.10.0
libtpu: 0.0.40
codegen_flags: <defaults>
</compile_context>

<pallas_src>
import functools

import jax
import jax.numpy as jnp
from jax import lax
from jax.experimental import pallas as pl
from jax.experimental.pallas import tpu as pltpu

# ---- module hyper-parameters (synthetic, deterministic) ---------------------
INPUT_DIM = 64
HIDDEN = 32
LAYER_N = 2
ACTIVATION_ID = 1        # 0=Tanh, 1=ReLU, 2=LeakyReLU, 3=ELU
LN_EPS = 1e-5            # torch.nn.LayerNorm default eps
PAD = 128                # lane-dense padded hidden width inside the kernel
MATMUL_DTYPE = jnp.bfloat16   # bf16-native MXU on v5e/v6e/v7x; jnp.float32 for exact f32

# Batch-tile cap derived from a conservative VMEM budget (v5e scoped default is
# 16 MiB; in/out blocks are double-buffered by the BlockSpec pipeline). At this
# cap the total footprint (in + out + weights) is a few MiB, so no
# vmem_limit_bytes override is required on any generation.
_VMEM_BUDGET_BYTES = 8 * 1024 * 1024
_BYTES_PER_ROW = 2 * 4 * (INPUT_DIM + HIDDEN)          # double-buffered f32 in + out
MAX_TB = min(2048, (_VMEM_BUDGET_BYTES // _BYTES_PER_ROW) // 8 * 8)


def _apply_activation(h, activation_id):
    if activation_id == 0:
        return jnp.tanh(h)
    elif activation_id == 1:
        return jnp.maximum(h, 0.0)
    elif activation_id == 2:
        # torch.nn.LeakyReLU default negative_slope = 0.01
        return jnp.where(h >= 0.0, h, 0.01 * h)
    else:
        # torch.nn.ELU default alpha = 1.0
        return jnp.where(h >= 0.0, h, jnp.expm1(h))


def fused_mlp_kernel(x_ref, w_ref, bgb_ref, o_ref, *,
                     num_layers, activation_id, input_dim, hidden, eps):
    """All layers fused: repeat LayerNorm(act(h @ W_l + b_l)) with h kept in vregs.

    x_ref:   (TB, input_dim) f32        unpadded input tile
    w_ref:   (L, PAD, PAD)   MATMUL_DTYPE, zero-padded weights (stored (in, out))
    bgb_ref: (L, 3, PAD)     f32         rows = [bias, gamma, beta], zero-padded
    o_ref:   (TB, hidden)    f32         direct unpadded output tile
    """
    inv_h = jnp.float32(1.0 / hidden)
    h = x_ref[...]                                        # (TB, input_dim) f32

    for l in range(num_layers):                           # static unroll
        if l == 0:
            w = w_ref[0, 0:input_dim, :]                  # (input_dim, PAD)
        else:
            w = w_ref[l]                                  # (PAD, PAD)
        bgb = bgb_ref[l]                                  # (3, PAD) f32
        z = jnp.dot(h.astype(w.dtype), w,
                    preferred_element_type=jnp.float32) + bgb[0:1, :]
        z = _apply_activation(z, activation_id)
        # Padded lanes of z are exactly 0 (zero weight cols + zero bias, and
        # act(0) == 0 for all four activations), so 128-lane sums equal sums
        # over the `hidden` real lanes. Variance via E[z^2] - mean^2 avoids the
        # per-layer mask multiply entirely.
        mean = jnp.sum(z, axis=-1, keepdims=True) * inv_h
        var = jnp.sum(z * z, axis=-1, keepdims=True) * inv_h - mean * mean
        h = (z - mean) * lax.rsqrt(var + eps) * bgb[1:2, :] + bgb[2:3, :]
        # gamma/beta pad lanes are 0 -> pad lanes of h return to exactly 0.

    o_ref[...] = h[:, :hidden].astype(o_ref.dtype)


def _pick_batch_tile(B):
    """Largest sublane-aligned divisor of B that (a) stays under the VMEM-derived
    cap and (b) yields >= 2 grid steps when possible, so v7x's two TensorCores
    both receive work from the "parallel" batch axis."""
    assert B % 8 == 0, "batch must be a multiple of 8 (sublane alignment)"
    # TODO(synk): pad the batch (or mask the final tile) to support arbitrary B.
    ideal = min(MAX_TB, max(8, B // 2))
    tb = (ideal // 8) * 8
    while B % tb != 0:
        tb -= 8
    return tb


def mlp_layer_forward(x, packed):
    """x: (B, INPUT_DIM) f32 -> (B, HIDDEN) f32, all layers in one pallas_call."""
    w_stack, bgb_stack = packed
    num_layers = w_stack.shape[0]
    B, d_in = x.shape
    assert d_in == INPUT_DIM and d_in % 8 == 0 and d_in <= PAD and HIDDEN <= PAD

    TB = _pick_batch_tile(B)

    kernel = functools.partial(
        fused_mlp_kernel,
        num_layers=num_layers,
        activation_id=ACTIVATION_ID,
        input_dim=d_in,
        hidden=HIDDEN,
        eps=LN_EPS,
    )

    return pl.pallas_call(
        kernel,
        out_shape=jax.ShapeDtypeStruct((B, HIDDEN), jnp.float32),
        grid_spec=pltpu.PrefetchScalarGridSpec(
            num_scalar_prefetch=0,
            grid=(B // TB,),
            in_specs=[
                # Unpadded input tile: last dim == full array dim -> legal block.
                pl.BlockSpec((TB, d_in), lambda i: (i, 0)),
                # Grid-invariant stacked weights / (bias, gamma, beta).
                pl.BlockSpec((num_layers, PAD, PAD), lambda i: (0, 0, 0)),
                pl.BlockSpec((num_layers, 3, PAD), lambda i: (0, 0, 0)),
            ],
            # Unpadded output tile: last dim (32) == full array dim -> legal.
            out_specs=pl.BlockSpec((TB, HIDDEN), lambda i: (i, 0)),
        ),
        compiler_params=pltpu.CompilerParams(
            dimension_semantics=("parallel",)),
    )(x, w_stack, bgb_stack)


def init_params(key, input_dim, hidden, layer_n):
    """Deterministic synthetic parameters, natural (unpadded) shapes.

    Mirrors MLPLayer: fc1 = Linear(input_dim, hidden) + LayerNorm, then layer_n
    copies of Linear(hidden, hidden) + LayerNorm. Weights stored transposed as
    (in, out). LayerNorm gamma=1, beta=0 (PyTorch default).
    """
    # TODO(synk): exact orthogonal/xavier init with calculate_gain not reproduced;
    # scaled normal weights + zero bias used instead (shapes/semantics identical).
    params = []
    dims = [(input_dim, hidden)] + [(hidden, hidden)] * layer_n
    for (din, dout) in dims:
        key, kw = jax.random.split(key)
        w = jax.random.normal(kw, (din, dout), jnp.float32) * (1.0 / jnp.sqrt(din))
        b = jnp.zeros((dout,), jnp.float32)
        gamma = jnp.ones((dout,), jnp.float32)
        beta = jnp.zeros((dout,), jnp.float32)
        params.append((w, b, gamma, beta))
    return params


def pack_params(params, matmul_dtype=MATMUL_DTYPE):
    """Zero-pad every layer to PAD lanes; stack weights as (L, PAD, PAD) in the
    matmul dtype and (bias, gamma, beta) together as one (L, 3, PAD) f32 array."""
    ws, bgbs = [], []
    for (w, b, gamma, beta) in params:
        din, dout = w.shape
        ws.append(jnp.pad(w, ((0, PAD - din), (0, PAD - dout))).astype(matmul_dtype))
        bgbs.append(jnp.stack([
            jnp.pad(b, (0, PAD - dout)),
            jnp.pad(gamma, (0, PAD - dout)),
            jnp.pad(beta, (0, PAD - dout)),
        ]).astype(jnp.float32))
    return jnp.stack(ws), jnp.stack(bgbs)


def _reference(x, params, activation_id=ACTIVATION_ID, matmul_dtype=jnp.float32):
    """Pure-JAX reference on the unpadded parameters (matmul dtype selectable)."""
    h = x
    for (w, b, gamma, beta) in params:
        z = jnp.dot(h.astype(matmul_dtype), w.astype(matmul_dtype),
                    preferred_element_type=jnp.float32) + b
        z = _apply_activation(z, activation_id)
        mean = jnp.mean(z, axis=-1, keepdims=True)
        var = jnp.mean((z - mean) ** 2, axis=-1, keepdims=True)
        h = (z - mean) * lax.rsqrt(var + LN_EPS) * gamma + beta
    return h


if __name__ == "__main__":
    key = jax.random.PRNGKey(0)
    kx, kp = jax.random.split(key)

    batch = 16
    x = jax.random.normal(kx, (batch, INPUT_DIM), jnp.float32)
    params = init_params(kp, INPUT_DIM, HIDDEN, LAYER_N)
    packed = pack_params(params)

    out = jax.block_until_ready(mlp_layer_forward(x, packed))
    assert out.shape == (batch, HIDDEN)
    assert bool(jnp.all(jnp.isfinite(out)))

    # Tight check against a reference that uses the same matmul precision as the
    # kernel (validates fusion / padding / LayerNorm logic).
    ref_matched = _reference(x, params, matmul_dtype=MATMUL_DTYPE)
    assert jnp.allclose(out, ref_matched, atol=5e-4, rtol=5e-4)

    # Looser sanity check against the pure-f32 reference (bf16 matmul rounding).
    ref_f32 = _reference(x, params, matmul_dtype=jnp.float32)
    assert jnp.allclose(out, ref_f32, atol=5e-2, rtol=5e-2)

    print("KERNEL_OK")
</pallas_src>

<mosaic_0001>
module attributes {stable_mosaic.version = 11 : i64} {
  func.func @fused_mlp_kernel(%arg0: i32, %arg1: memref<8x64xf32, #tpu.memory_space<vmem>>, %arg2: memref<3x128x128xbf16, #tpu.memory_space<vmem>>, %arg3: memref<3x3x128xf32, #tpu.memory_space<vmem>>, %arg4: memref<8x32xf32, #tpu.memory_space<vmem>>) attributes {dimension_semantics = [#tpu.dimension_semantics<parallel>], iteration_bounds = array<i64: 2>, scalar_prefetch = 0 : i64, scratch_operands = 0 : i64, tpu.core_type = #tpu.core_type<tc>, window_params = [{transform_indices = @transform_0, window_bounds = array<i64: 8, 64>}, {pipeline_mode = #tpu.pipeline_mode<synchronous>, transform_indices = @transform_1, window_bounds = array<i64: 3, 128, 128>}, {pipeline_mode = #tpu.pipeline_mode<synchronous>, transform_indices = @transform_2, window_bounds = array<i64: 3, 3, 128>}, {transform_indices = @transform_3, window_bounds = array<i64: 8, 32>}]} {
    %c0 = arith.constant 0 : index
    %c0_0 = arith.constant 0 : index
    %0 = vector.load %arg1[%c0, %c0_0] : memref<8x64xf32, #tpu.memory_space<vmem>>, vector<8x64xf32>
    %c0_1 = arith.constant 0 : index
    %c0_2 = arith.constant 0 : index
    %c0_3 = arith.constant 0 : index
    %1 = vector.load %arg2[%c0_1, %c0_2, %c0_3] : memref<3x128x128xbf16, #tpu.memory_space<vmem>>, vector<1x64x128xbf16>
    %2 = vector.shape_cast %1 : vector<1x64x128xbf16> to vector<64x128xbf16>
    %c0_4 = arith.constant 0 : index
    %c0_5 = arith.constant 0 : index
    %c0_6 = arith.constant 0 : index
    %3 = vector.load %arg3[%c0_4, %c0_5, %c0_6] : memref<3x3x128xf32, #tpu.memory_space<vmem>>, vector<1x3x128xf32>
    %4 = vector.shape_cast %3 : vector<1x3x128xf32> to vector<3x128xf32>
    %5 = arith.truncf %0 : vector<8x64xf32> to vector<8x64xbf16>
    %cst = arith.constant dense<0.000000e+00> : vector<8x128xf32>
    %6 = tpu.matmul %5, %2, %cst {dimension_numbers = #tpu.dot_dimension_numbers<[1], [0], [0], [1], [0, 0, 1, 1], [], []>} : vector<8x64xbf16>, vector<64x128xbf16>, vector<8x128xf32> -> vector<8x128xf32>
    %7 = vector.extract_strided_slice %4 {offsets = [0, 0], sizes = [1, 128], strides = [1, 1]} : vector<3x128xf32> to vector<1x128xf32>
    %8 = vector.broadcast %7 : vector<1x128xf32> to vector<8x128xf32>
    %9 = arith.addf %6, %8 : vector<8x128xf32>
    %cst_7 = arith.constant 0.000000e+00 : f32
    %10 = vector.broadcast %cst_7 : f32 to vector<8x128xf32>
    %11 = arith.maximumf %9, %10 : vector<8x128xf32>
    %cst_8 = arith.constant dense<0.000000e+00> : vector<8xf32>
    %12 = vector.multi_reduction <add>, %11, %cst_8 [1] : vector<8x128xf32> to vector<8xf32>
    %13 = vector.shape_cast %12 : vector<8xf32> to vector<8x1xf32>
    %cst_9 = arith.constant 3.125000e-02 : f32
    %14 = vector.broadcast %cst_9 : f32 to vector<8x1xf32>
    %15 = arith.mulf %13, %14 : vector<8x1xf32>
    %16 = arith.mulf %11, %11 : vector<8x128xf32>
    %cst_10 = arith.constant dense<0.000000e+00> : vector<8xf32>
    %17 = vector.multi_reduction <add>, %16, %cst_10 [1] : vector<8x128xf32> to vector<8xf32>
    %18 = vector.shape_cast %17 : vector<8xf32> to vector<8x1xf32>
    %cst_11 = arith.constant 3.125000e-02 : f32
    %19 = vector.broadcast %cst_11 : f32 to vector<8x1xf32>
    %20 = arith.mulf %18, %19 : vector<8x1xf32>
    %21 = arith.mulf %15, %15 : vector<8x1xf32>
    %22 = arith.subf %20, %21 : vector<8x1xf32>
    %23 = vector.broadcast %15 : vector<8x1xf32> to vector<8x128xf32>
    %24 = arith.subf %11, %23 : vector<8x128xf32>
    %cst_12 = arith.constant 9.99999974E-6 : f32
    %25 = vector.broadcast %cst_12 : f32 to vector<8x1xf32>
    %26 = arith.addf %22, %25 : vector<8x1xf32>
    %27 = math.rsqrt %26 : vector<8x1xf32>
    %28 = vector.broadcast %27 : vector<8x1xf32> to vector<8x128xf32>
    %29 = arith.mulf %24, %28 : vector<8x128xf32>
    %30 = vector.extract_strided_slice %4 {offsets = [1, 0], sizes = [1, 128], strides = [1, 1]} : vector<3x128xf32> to vector<1x128xf32>
    %31 = vector.broadcast %30 : vector<1x128xf32> to vector<8x128xf32>
    %32 = arith.mulf %29, %31 : vector<8x128xf32>
    %33 = vector.extract_strided_slice %4 {offsets = [2, 0], sizes = [1, 128], strides = [1, 1]} : vector<3x128xf32> to vector<1x128xf32>
    %34 = vector.broadcast %33 : vector<1x128xf32> to vector<8x128xf32>
    %35 = arith.addf %32, %34 : vector<8x128xf32>
    %c1 = arith.constant 1 : index
    %c0_13 = arith.constant 0 : index
    %c0_14 = arith.constant 0 : index
    %36 = vector.load %arg2[%c1, %c0_13, %c0_14] : memref<3x128x128xbf16, #tpu.memory_space<vmem>>, vector<1x128x128xbf16>
    %37 = vector.shape_cast %36 : vector<1x128x128xbf16> to vector<128x128xbf16>
    %c1_15 = arith.constant 1 : index
    %c0_16 = arith.constant 0 : index
    %c0_17 = arith.constant 0 : index
    %38 = vector.load %arg3[%c1_15, %c0_16, %c0_17] : memref<3x3x128xf32, #tpu.memory_space<vmem>>, vector<1x3x128xf32>
    %39 = vector.shape_cast %38 : vector<1x3x128xf32> to vector<3x128xf32>
    %40 = arith.truncf %35 : vector<8x128xf32> to vector<8x128xbf16>
    %cst_18 = arith.constant dense<0.000000e+00> : vector<8x128xf32>
    %41 = tpu.matmul %40, %37, %cst_18 {dimension_numbers = #tpu.dot_dimension_numbers<[1], [0], [0], [1], [0, 0, 1, 1], [], []>} : vector<8x128xbf16>, vector<128x128xbf16>, vector<8x128xf32> -> vector<8x128xf32>
    %42 = vector.extract_strided_slice %39 {offsets = [0, 0], sizes = [1, 128], strides = [1, 1]} : vector<3x128xf32> to vector<1x128xf32>
    %43 = vector.broadcast %42 : vector<1x128xf32> to vector<8x128xf32>
    %44 = arith.addf %41, %43 : vector<8x128xf32>
    %cst_19 = arith.constant 0.000000e+00 : f32
    %45 = vector.broadcast %cst_19 : f32 to vector<8x128xf32>
    %46 = arith.maximumf %44, %45 : vector<8x128xf32>
    %cst_20 = arith.constant dense<0.000000e+00> : vector<8xf32>
    %47 = vector.multi_reduction <add>, %46, %cst_20 [1] : vector<8x128xf32> to vector<8xf32>
    %48 = vector.shape_cast %47 : vector<8xf32> to vector<8x1xf32>
    %cst_21 = arith.constant 3.125000e-02 : f32
    %49 = vector.broadcast %cst_21 : f32 to vector<8x1xf32>
    %50 = arith.mulf %48, %49 : vector<8x1xf32>
    %51 = arith.mulf %46, %46 : vector<8x128xf32>
    %cst_22 = arith.constant dense<0.000000e+00> : vector<8xf32>
    %52 = vector.multi_reduction <add>, %51, %cst_22 [1] : vector<8x128xf32> to vector<8xf32>
    %53 = vector.shape_cast %52 : vector<8xf32> to vector<8x1xf32>
    %cst_23 = arith.constant 3.125000e-02 : f32
    %54 = vector.broadcast %cst_23 : f32 to vector<8x1xf32>
    %55 = arith.mulf %53, %54 : vector<8x1xf32>
    %56 = arith.mulf %50, %50 : vector<8x1xf32>
    %57 = arith.subf %55, %56 : vector<8x1xf32>
    %58 = vector.broadcast %50 : vector<8x1xf32> to vector<8x128xf32>
    %59 = arith.subf %46, %58 : vector<8x128xf32>
    %cst_24 = arith.constant 9.99999974E-6 : f32
    %60 = vector.broadcast %cst_24 : f32 to vector<8x1xf32>
    %61 = arith.addf %57, %60 : vector<8x1xf32>
    %62 = math.rsqrt %61 : vector<8x1xf32>
    %63 = vector.broadcast %62 : vector<8x1xf32> to vector<8x128xf32>
    %64 = arith.mulf %59, %63 : vector<8x128xf32>
    %65 = vector.extract_strided_slice %39 {offsets = [1, 0], sizes = [1, 128], strides = [1, 1]} : vector<3x128xf32> to vector<1x128xf32>
    %66 = vector.broadcast %65 : vector<1x128xf32> to vector<8x128xf32>
    %67 = arith.mulf %64, %66 : vector<8x128xf32>
    %68 = vector.extract_strided_slice %39 {offsets = [2, 0], sizes = [1, 128], strides = [1, 1]} : vector<3x128xf32> to vector<1x128xf32>
    %69 = vector.broadcast %68 : vector<1x128xf32> to vector<8x128xf32>
    %70 = arith.addf %67, %69 : vector<8x128xf32>
    %c2 = arith.constant 2 : index
    %c0_25 = arith.constant 0 : index
    %c0_26 = arith.constant 0 : index
    %71 = vector.load %arg2[%c2, %c0_25, %c0_26] : memref<3x128x128xbf16, #tpu.memory_space<vmem>>, vector<1x128x128xbf16>
    %72 = vector.shape_cast %71 : vector<1x128x128xbf16> to vector<128x128xbf16>
    %c2_27 = arith.constant 2 : index
    %c0_28 = arith.constant 0 : index
    %c0_29 = arith.constant 0 : index
    %73 = vector.load %arg3[%c2_27, %c0_28, %c0_29] : memref<3x3x128xf32, #tpu.memory_space<vmem>>, vector<1x3x128xf32>
    %74 = vector.shape_cast %73 : vector<1x3x128xf32> to vector<3x128xf32>
    %75 = arith.truncf %70 : vector<8x128xf32> to vector<8x128xbf16>
    %cst_30 = arith.constant dense<0.000000e+00> : vector<8x128xf32>
    %76 = tpu.matmul %75, %72, %cst_30 {dimension_numbers = #tpu.dot_dimension_numbers<[1], [0], [0], [1], [0, 0, 1, 1], [], []>} : vector<8x128xbf16>, vector<128x128xbf16>, vector<8x128xf32> -> vector<8x128xf32>
    %77 = vector.extract_strided_slice %74 {offsets = [0, 0], sizes = [1, 128], strides = [1, 1]} : vector<3x128xf32> to vector<1x128xf32>
    %78 = vector.broadcast %77 : vector<1x128xf32> to vector<8x128xf32>
    %79 = arith.addf %76, %78 : vector<8x128xf32>
    %cst_31 = arith.constant 0.000000e+00 : f32
    %80 = vector.broadcast %cst_31 : f32 to vector<8x128xf32>
    %81 = arith.maximumf %79, %80 : vector<8x128xf32>
    %cst_32 = arith.constant dense<0.000000e+00> : vector<8xf32>
    %82 = vector.multi_reduction <add>, %81, %cst_32 [1] : vector<8x128xf32> to vector<8xf32>
    %83 = vector.shape_cast %82 : vector<8xf32> to vector<8x1xf32>
    %cst_33 = arith.constant 3.125000e-02 : f32
    %84 = vector.broadcast %cst_33 : f32 to vector<8x1xf32>
    %85 = arith.mulf %83, %84 : vector<8x1xf32>
    %86 = arith.mulf %81, %81 : vector<8x128xf32>
    %cst_34 = arith.constant dense<0.000000e+00> : vector<8xf32>
    %87 = vector.multi_reduction <add>, %86, %cst_34 [1] : vector<8x128xf32> to vector<8xf32>
    %88 = vector.shape_cast %87 : vector<8xf32> to vector<8x1xf32>
    %cst_35 = arith.constant 3.125000e-02 : f32
    %89 = vector.broadcast %cst_35 : f32 to vector<8x1xf32>
    %90 = arith.mulf %88, %89 : vector<8x1xf32>
    %91 = arith.mulf %85, %85 : vector<8x1xf32>
    %92 = arith.subf %90, %91 : vector<8x1xf32>
    %93 = vector.broadcast %85 : vector<8x1xf32> to vector<8x128xf32>
    %94 = arith.subf %81, %93 : vector<8x128xf32>
    %cst_36 = arith.constant 9.99999974E-6 : f32
    %95 = vector.broadcast %cst_36 : f32 to vector<8x1xf32>
    %96 = arith.addf %92, %95 : vector<8x1xf32>
    %97 = math.rsqrt %96 : vector<8x1xf32>
    %98 = vector.broadcast %97 : vector<8x1xf32> to vector<8x128xf32>
    %99 = arith.mulf %94, %98 : vector<8x128xf32>
    %100 = vector.extract_strided_slice %74 {offsets = [1, 0], sizes = [1, 128], strides = [1, 1]} : vector<3x128xf32> to vector<1x128xf32>
    %101 = vector.broadcast %100 : vector<1x128xf32> to vector<8x128xf32>
    %102 = arith.mulf %99, %101 : vector<8x128xf32>
    %103 = vector.extract_strided_slice %74 {offsets = [2, 0], sizes = [1, 128], strides = [1, 1]} : vector<3x128xf32> to vector<1x128xf32>
    %104 = vector.broadcast %103 : vector<1x128xf32> to vector<8x128xf32>
    %105 = arith.addf %102, %104 : vector<8x128xf32>
    %106 = vector.extract_strided_slice %105 {offsets = [0, 0], sizes = [8, 32], strides = [1, 1]} : vector<8x128xf32> to vector<8x32xf32>
    %c0_37 = arith.constant 0 : index
    %c0_38 = arith.constant 0 : index
    %107 = vector.load %arg4[%c0_37, %c0_38] : memref<8x32xf32, #tpu.memory_space<vmem>>, vector<8x32xf32>
    tpu.vector_store %arg4[%c0_37, %c0_38], %106 {strides = array<i32>} : memref<8x32xf32, #tpu.memory_space<vmem>>, vector<8x32xf32>,
    return
  }
  func.func @transform_0(%arg0: i32) -> (i32, i32) {
    %c0_i32 = arith.constant 0 : i32
    %c0_i32_0 = arith.constant 0 : i32
    return %arg0, %c0_i32 : i32, i32
  }
  func.func @transform_1(%arg0: i32) -> (i32, i32, i32) {
    %c0_i32 = arith.constant 0 : i32
    %c0_i32_0 = arith.constant 0 : i32
    %c0_i32_1 = arith.constant 0 : i32
    %c0_i32_2 = arith.constant 0 : i32
    return %c0_i32, %c0_i32_0, %c0_i32_1 : i32, i32, i32
  }
  func.func @transform_2(%arg0: i32) -> (i32, i32, i32) {
    %c0_i32 = arith.constant 0 : i32
    %c0_i32_0 = arith.constant 0 : i32
    %c0_i32_1 = arith.constant 0 : i32
    %c0_i32_2 = arith.constant 0 : i32
    return %c0_i32, %c0_i32_0, %c0_i32_1 : i32, i32, i32
  }
  func.func @transform_3(%arg0: i32) -> (i32, i32) {
    %c0_i32 = arith.constant 0 : i32
    %c0_i32_0 = arith.constant 0 : i32
    return %arg0, %c0_i32 : i32, i32
  }
}

</mosaic_0001>

<bundles_post_ra>
// kernel: tpu_custom_call.1
= control target key start
LH: loop header
LB: loop body
LE: loop exit
PB: predicated region body
PF: predicated region fallthrough
CT: control target
= control target key end

     0   :  { %8 = vsyncpa [#allocation3], 0  ;;  %s1369_s0 = inlined_call_operand.hbm [shape: f32[16,64], index: 0, kind: input, shape index: {}]   ;;  %s1370_s1 = inlined_call_operand.hbm [shape: bf16[3,128,128], index: 1, kind: input, shape index: {}]   ;;  %s1371_s2 = inlined_call_operand.hbm [shape: f32[3,3,128], index: 2, kind: input, shape index: {}]   ;;  %s1372_s3 = inlined_call_operand.hbm [shape: f32[16,32], index: 3, kind: output, shape index: {}]  }
   0x1   :  { %10 = vsyncpa [#allocation3 + $0x1], 0 }
   0x2   :  { %11 = vsyncpa [#allocation6], 0 }
   0x3   :  { %12 = vsyncpa [#allocation4], 0 }
   0x4   :  { %14 = vsyncpa [#allocation4 + $0x1], 0  ;;  %s1095_s12 = smov 0   ;;  %s1097_s13 = smov 0  }
   0x5   :  { %s1099_s14 = smov 0   ;;  %s1101_s15 = smov 0  }
   0x6 LB: > { %s1116_s16 = sadd.s32 4294967295, %s1065_s15   ;;  %s700_s17 = sadd.s32 4294967294, %s1065_s15   ;;  %s1065_s15 = sphi %s1101_s15, %s1392_s15   ;;  %s1061_s14 = sphi %s1099_s14, %s1391_s14   ;;  %s1057_s13 = sphi %s1097_s13, %s1390_s13   ;;  %s1053_s12 = sphi %s1095_s12, %s1389_s12  }
   0x7   : > { %p40_p0 = scmp.ne.s32.totalorder %s1057_s13, %s1053_s12  ;;  %p1373_p1 = scmp.eq.s32.totalorder %s1116_s16, 0 }
   0x8   : > { %p112_p3 = scmp.eq.s32.totalorder %s700_s17, 1  ;;  %p701_p5 = scmp.ge.s32.totalorder %s1065_s15, 1 }
   0x9   : > { %p1125_p4 = por %p1373_p1, %p40_p0  ;;  %p119_p7 = scmp.lt.s32.totalorder %s1065_s15, 3 }
   0xa   : > { %p1130_p6 = por %p112_p3, %p40_p0  ;;  %s1067_s21 = smov [#allocation5]  }
   0xb   : > { %s1376_s18 = scalar_select %p1125_p4, 1, 0 }
   0xc   : > { %s1377_s19 = scalar_select %p1130_p6, 1, 0 }
   0xd   : > { %p1135_p8 = pnand %p701_p5, %p119_p7  ;;  %s131_s22 = sshll.u32 %s1067_s21, 4  ;;  %s1139_s22 = int_to_ptr.vmem [resolvable:$true] %s131_s22 }
   0xe   : > { %s1068_s24 = smov [#allocation7]   ;;  %s909_s28 = scalar_lea.hbm %s1370_s1, 3072 }
   0xf   : > { %p824_p9 = pneg %p1135_p8  ;;  %s144_s25 = sshll.u32 %s1068_s24, 4  ;;  %s1150_s25 = int_to_ptr.vmem [resolvable:$true] %s144_s25 }
  0x10   : > { %p910_p12 = scmp.ne.s32.totalorder %s1370_s1, %s909_s28  ;;  %p916_p5 = scmp.lt.u32.totalorder %s909_s28, %s1370_s1 }
  0x11   : > { %p1146_p11 = pnand %p824_p9, %p1373_p1 }
  0x13   : > { %p911_p13 = pneg %p1146_p11 }
  0x15   : > { %p912_p0 = pnand %p911_p13, %p910_p12 }
  0x17   : > { %p913_p3 = pneg %p912_p0 }
  0x19   : > { %p918_p7 = pnand %p916_p5, %p913_p3 }
  0x1b   : > { %921 = shalt.err (!%p918_p7)
}
  0x1c   : > { %s922_s6 = scalar_lea.vmem %s1139_s22, 3072  ;;  %p930_p2 = scmp.lt.s32.totalorder %s1139_s22, %s1139_s22 }
  0x1d   : > { %p923_p9 = scmp.ne.s32.totalorder %s1139_s22, %s922_s6  ;;  %p931_p12 = scmp.lt.s32.totalorder %s922_s6, %s922_s6 }
  0x1f   : > { %p925_p10 = pnand %p923_p9, %p911_p13  ;;  %p932_p0 = por %p931_p12, %p930_p2 }
  0x21   : > { %p926_p1 = pneg %p925_p10 }
  0x23   : > { %p933_p6 = pnand %p932_p0, %p926_p1 }
  0x25   : > { %936 = shalt.err (!%p933_p6)
}
  0x26   : > { %s1069_s7 = smov 64   ;;  %s1070_s8 = smov 4  }
  0x27   : > { %827 = dma.hbm_to_vmem [thread:$0]  (!%p1146_p11), %s1370_s1, 3072, %s1139_s22, [#allocation6], %s1069_s7, %s1069_s7, %s1070_s8  }
  0x28   : > { %s937_s21 = scalar_lea.hbm %s1371_s2, 192 }
  0x29   : > { %p938_p2 = scmp.ne.s32.totalorder %s1371_s2, %s937_s21  ;;  %p944_p10 = scmp.lt.u32.totalorder %s937_s21, %s1371_s2 }
  0x2b   : > { %p940_p1 = pnand %p938_p2, %p911_p13 }
  0x2d   : > { %p941_p6 = pneg %p940_p1 }
  0x2f   : > { %p946_p3 = pnand %p944_p10, %p941_p6 }
  0x31   : > { %949 = shalt.err (!%p946_p3)
}
  0x32   : > { %s950_s22 = scalar_lea.vmem %s1150_s25, 192  ;;  %p958_p12 = scmp.lt.s32.totalorder %s1150_s25, %s1150_s25 }
  0x33   : > { %p951_p5 = scmp.ne.s32.totalorder %s1150_s25, %s950_s22  ;;  %p959_p0 = scmp.lt.s32.totalorder %s950_s22, %s950_s22 }
  0x35   : > { %p953_p7 = pnand %p951_p5, %p911_p13  ;;  %p960_p2 = por %p959_p0, %p958_p12 }
  0x37   : > { %p954_p9 = pneg %p953_p7 }
  0x39   : > { %p961_p1 = pnand %p960_p2, %p954_p9 }
  0x3b   : > { %964 = shalt.err (!%p961_p1)
}
  0x3c   : > { %830 = dma.hbm_to_vmem [thread:$0]  (!%p1146_p11), %s1371_s2, 192, %s1150_s25, [#allocation6], %s1069_s7, %s1069_s7, %s1070_s8  }
  0x3d   : > { %s1205_s4 = sadd.s32 1, %s1065_s15   ;;  %s27_s23 = sadd.s32 1, %s1061_s14 }
  0x3e   : > { %s24_s5 = ssub.s32 %s1065_s15, %s1205_s4  ;;  %p34_p13 = scmp.ne.s32.totalorder %s1061_s14, %s1057_s13 }
  0x3f   : > { %p25_p6 = scmp.eq.s32.totalorder %s24_s5, 0  ;;  %p35_p10 = scmp.eq.s32.totalorder %s1065_s15, 0 }
  0x40   : > { %p1380_p3 = scmp.eq.s32.totalorder %s1116_s16, 1  ;;  %p841_p7 = scmp.lt.s32.totalorder %s1065_s15, 2 }
  0x41   : > { %s1221_s9 = scalar_select %p25_p6, %s1061_s14, %s27_s23  }
  0x42   : > { %p1215_p5 = por %p1380_p3, %p34_p13  ;;  %p36_p9 = por %p35_p10, %p34_p13 }
  0x43   : > { %s158_s10 = sand.u32 1, %s1061_s14   ;;  %s706_s25 = sshll.u32 %s1065_s15, 7 }
  0x44   : > { %s1381_s6 = scalar_select %p1215_p5, 1, 0 }
  0x45   : > { %s705_s11 = sshll.u32 %s158_s10, 3  ;;  %s1228_s17 = scalar_lea.hbm %s1369_s0, %s706_s25 }
  0x46   : > { %s162_s21 = scalar_lea.vmem [#allocation2], %s705_s11  ;;  %p1232_p11 = pnand %p841_p7, %p36_p9 }
  0x47   : > { %s169_s24 = sshll.u32 %s162_s21, 4  ;;  %s159_s27 = scalar_lea.sflag [#allocation3], %s158_s10  ;;  %s1230_s24 = int_to_ptr.vmem [resolvable:$true] %s169_s24 }
  0x48   : > { %s965_s28 = scalar_lea.hbm %s1228_s17, 128  ;;  %p967_p0 = pneg %p1232_p11 }
  0x49   : > { %p966_p12 = scmp.ne.s32.totalorder %s1228_s17, %s965_s28  ;;  %s970_s30 = scalar_lea.hbm %s1369_s0, 256 }
  0x4a   : > { %p971_p13 = scmp.lt.u32.totalorder %s1228_s17, %s1369_s0  ;;  %p972_p6 = scmp.lt.u32.totalorder %s970_s30, %s965_s28 }
  0x4b   : > { %p968_p2 = pnand %p967_p0, %p966_p12  ;;  %p974_p3 = scmp.lt.u32.totalorder %s965_s28, %s1228_s17 }
  0x4c   : > { %p973_p10 = por %p972_p6, %p971_p13 }
  0x4d   : > { %p969_p1 = pneg %p968_p2 }
  0x4e   : > { %p975_p7 = por %p974_p3, %p973_p10 }
  0x50   : > { %p976_p9 = pnand %p975_p7, %p969_p1 }
  0x52   : > { %979 = shalt.err (!%p976_p9)
}
  0x53   : > { %s980_s10 = scalar_lea.vmem %s1230_s24, 128  ;;  %s1071_s11 = smov [#allocation2]  }
  0x54   : > { %p981_p12 = scmp.ne.s32.totalorder %s1230_s24, %s980_s10  ;;  %s985_s25 = sshll.u32 %s1071_s11, 4  ;;  %s986_s25 = int_to_ptr.vmem [resolvable:$false] %s985_s25 }
  0x55   : > { %s987_s7 = scalar_lea.vmem %s986_s25, 256  ;;  %p988_p4 = scmp.lt.s32.totalorder %s1230_s24, %s986_s25 }
  0x56   : > { %p983_p2 = pnand %p981_p12, %p967_p0  ;;  %p989_p13 = scmp.lt.s32.totalorder %s987_s7, %s980_s10 }
  0x58   : > { %p984_p5 = pneg %p983_p2  ;;  %p990_p6 = por %p989_p13, %p988_p4 }
  0x5a   : > { %p991_p10 = pnand %p990_p6, %p984_p5 }
  0x5c   : > { %994 = shalt.err (!%p991_p10)
}
  0x5d   : > { %834 = dma.hbm_to_vmem [thread:$0]  (!%p1232_p11), %s1228_s17, 128, %s1230_s24, %s159_s27  }
  0x5e   : > { %178 = sbr.rel (%p1135_p8) target bundleno = 1294 (0x50e), region = 32  ;;  %s1264_s8 = sand.u32 (!%p1135_p8), 1, %s1057_s13  }
  0x5f   : > { %s708_s21 = sshll.u32 (!%p1135_p8), %s1264_s8, 3  ;;  %s181_s28 = scalar_lea.sflag (!%p1135_p8), [#allocation3], %s1264_s8 }
  0x60   : > { %s184_s22 = scalar_lea.vmem (!%p1135_p8), [#allocation2], %s708_s21  ;;  %p1383_p4 = scmp.ne.s32.totalorder (!%p1135_p8), %s1376_s18, 0 }
  0x65   : > { %1040 = dma.done.wait (%p1383_p4), %s181_s28, 128  }
  0x66   : > { %1042 = vsyncadd (%p1383_p4), %s181_s28, 4294967168  ;;  %p1384_p5 = scmp.eq.s32.totalorder %s1116_s16, 0 }
  0x68   : > { %1044 = dma.done.wait (%p1384_p5), [#allocation6], 3264   ;;  %p1385_p8 = pmov %p1384_p5 }
  0x69   : > { %v1072_v0 = vmov 0.0   ;;  %vm1073_vm0 = vmmov 0   ;;  %v883_v1 = vld [vmem:[#allocation5] sm:$0xff]   ;;  %v884_v2 = vld [vmem:[#allocation5 + $0x8] sm:$0xff]   ;;  %v885_v3 = vld [vmem:[#allocation5 + $0x10] sm:$0xff]   ;;  %vm255_vm1 = vcmask 523264   ;;  %v227_v8 = vlaneseq }
  0x6a   : > { %1046 = vsyncadd (%p1385_p8), [#allocation6], 4294964032  ;;  %760 = vmatprep.subr.bf16.mxu0 %v1072_v0  ;;  %768 = vmatprep.mubr.msk.bf16.mxu0 %vm1073_vm0, %v1072_v0  ;;  %v886_v4 = vld [vmem:[#allocation5 + $0x18] sm:$0xff]   ;;  %v887_v7 = vld [vmem:[#allocation5 + $0x40] sm:$0xff]   ;;  %s734_s18 = sshll.u32 %s1116_s16, 7  ;;  %s214_s20 = scalar_lea.vmem [#allocation8], %s708_s21 }
  0x6b   : > { %772 = vmatprep.subr.bf16.mxu1 %v1072_v0  ;;  %788 = vmatprep.mubr.msk.bf16.mxu1 %vm1073_vm0, %v1072_v0  ;;  %v216_v5 = vld [vmem:[%s184_s22] sm:$0xff]  ;;  %v228_v9 = vshrl.u32 %v227_v8, 7  ;;  %v225_v11 = vld [vmem:[#allocation7] sm:$0x7]  ;;  %v888_v20 = vld [vmem:[#allocation5 + $0x48] sm:$0xff]   ;;  %s611_s17 = sshll.u32 %s214_s20, 4  ;;  %s1325_s27 = scalar_lea.hbm %s1372_s3, %s734_s18  ;;  %s1327_s17 = int_to_ptr.vmem [resolvable:$true] %s611_s17 }
  0x6c   : > { %761 = vmatpush3.bf16.msra.mxu0 %v883_v1  ;;  %v226_v6 = vpack.c.bf16 %v216_v5, %v216_v5  ;;  %773 = vmatpush3.bf16.msra.mxu1 %v887_v7  ;;  %v889_v21 = vld [vmem:[#allocation5 + $0x50] sm:$0xff]   ;;  %v890_v22 = vld [vmem:[#allocation5 + $0x58] sm:$0xff]   ;;  %v891_v23 = vld [vmem:[#allocation5 + $0x60] sm:$0xff]   ;;  %vm595_vm2 = vcmask 261120   ;;  %s598_s29 = scalar_lea.sflag [#allocation4], %s1264_s8  ;;  %s995_s30 = scalar_lea.vmem %s1327_s17, 128 }
  0x6d   : > { %762 = vmatprep.subr.bf16.mxu0 %v1072_v0  ;;  %774 = vmatprep.subr.bf16.mxu1 %v1072_v0  ;;  %v1291_v10 = vsub.s32 0, %v228_v9  ;;  %v892_v24 = vld [vmem:[#allocation5 + $0x68] sm:$0xff]   ;;  %v893_v25 = vld [vmem:[#allocation5 + $0x70] sm:$0xff]   ;;  %v894_v26 = vld [vmem:[#allocation5 + $0x78] sm:$0xff]   ;;  %v1300_v34 = vsub.s32 1, %v228_v9  ;;  %v1302_v35 = vsub.s32 2, %v228_v9  ;;  %p996_p11 = scmp.ne.s32.totalorder %s1327_s17, %s995_s30 }
  0x6e   : > { %v895_v44 = vld [vmem:[#allocation5 + $0x80] sm:$0xff]   ;;  %v896_v54 = vld [vmem:[#allocation5 + $0x88] sm:$0xff]   ;;  %v897_v55 = vld [vmem:[#allocation5 + $0x90] sm:$0xff]   ;;  %p1386_p0 = scmp.ne.s32.totalorder %s1381_s6, 0  ;;  %s1074_s16 = smov [#allocation8]  }
  0x6f   : > { %v230_v12 = vrot.slane %v225_v11, %v1291_v10  ;;  %v316_v36 = vrot.slane %v225_v11, %v1300_v34  ;;  %v321_v40 = vrot.slane %v225_v11, %v1302_v35  ;;  %v341_v45 = vld [vmem:[#allocation7 + $0x4] sm:$0x7]  ;;  %v898_v56 = vld [vmem:[#allocation5 + $0x98] sm:$0xff]   ;;  %v900_v58 = vld [vmem:[#allocation5 + $0xa8] sm:$0xff]   ;;  %s999_s23 = sshll.u32 %s1074_s16, 4  ;;  %s1000_s23 = int_to_ptr.vmem [resolvable:$false] %s999_s23 }
  0x70   : > { %763 = vmatpush3.bf16.msra.mxu0 %v884_v2  ;;  %775 = vmatpush3.bf16.msra.mxu1 %v888_v20  ;;  %v346_v46 = vrot.slane %v341_v45, %v1291_v10  ;;  %v899_v57 = vld [vmem:[#allocation5 + $0xa0] sm:$0xff]   ;;  %v901_v59 = vld [vmem:[#allocation5 + $0xb0] sm:$0xff]   ;;  %v902_v60 = vld [vmem:[#allocation5 + $0xb8] sm:$0xff]   ;;  %v452_v5 = vrot.slane %v341_v45, %v1300_v34  ;;  %v457_v8 = vrot.slane %v341_v45, %v1302_v35  ;;  %p997_p1 = pnand %p996_p11, %p1386_p0  ;;  %s1001_s5 = scalar_lea.vmem %s1000_s23, 256 }
  0x71   : > { %764 = vmatprep.subr.bf16.mxu0 %v1072_v0  ;;  %776 = vmatprep.subr.bf16.mxu1 %v1072_v0  ;;  %p1002_p7 = scmp.lt.s32.totalorder %s1327_s17, %s1000_s23  ;;  %p1003_p9 = scmp.lt.s32.totalorder %s1001_s5, %s995_s30 }
  0x72   : > { %p998_p3 = pneg %p997_p1 }
  0x73   : > { %p1004_p12 = por %p1003_p9, %p1002_p7 }
  0x74   : > { %765 = vmatpush3.bf16.msra.mxu0 %v885_v3  ;;  %777 = vmatpush3.bf16.msra.mxu1 %v889_v21 }
  0x75   : > { %766 = vmatprep.subr.bf16.mxu0 %v1072_v0  ;;  %778 = vmatprep.subr.bf16.mxu1 %v1072_v0  ;;  %p1005_p2 = pnand %p1004_p12, %p998_p3 }
  0x78   : > { %767 = vmatpush3.bf16.msra.mxu0 %v886_v4  ;;  %779 = vmatpush3.bf16.msra.mxu1 %v890_v22 }
  0x79   : > { %792 = vmatprep.subr.bf16.mxu0 %v1072_v0  ;;  %780 = vmatprep.subr.bf16.mxu1 %v1072_v0 }
  0x7b   : > { %769 = vmatmul.mubr.msk.bf16.vlgmr.msra.gmra.mrb[0].mxu0 %vm255_vm1, %v226_v6 }
  0x7c   : > { %808 = vmatprep.mubr.msk.bf16.mxu0 %vm1073_vm0, %v1072_v0  ;;  %781 = vmatpush3.bf16.msra.mxu1 %v891_v23 }
  0x7d   : > { %782 = vmatprep.subr.bf16.mxu1 %v1072_v0  ;;  %793 = vmatpush3.bf16.msra.mxu0 %v895_v44 }
  0x7e   : > { %794 = vmatprep.subr.bf16.mxu0 %v1072_v0 }
  0x80   : > { %783 = vmatpush3.bf16.msra.mxu1 %v892_v24 }
  0x81   : > { %784 = vmatprep.subr.bf16.mxu1 %v1072_v0  ;;  %795 = vmatpush3.bf16.msra.mxu0 %v896_v54 }
  0x82   : > { %796 = vmatprep.subr.bf16.mxu0 %v1072_v0 }
  0x84   : > { %785 = vmatpush3.bf16.msra.mxu1 %v893_v25 }
  0x85   : > { %786 = vmatprep.subr.bf16.mxu1 %v1072_v0  ;;  %797 = vmatpush3.bf16.msra.mxu0 %v897_v55 }
  0x86   : > { %798 = vmatprep.subr.bf16.mxu0 %v1072_v0 }
  0x88   : > { %787 = vmatpush3.bf16.msra.mxu1 %v894_v26 }
  0x89   : > { %799 = vmatpush3.bf16.msra.mxu0 %v898_v56 }
  0x8a   : > { %800 = vmatprep.subr.bf16.mxu0 %v1072_v0 }
  0x8d   : > { %801 = vmatpush3.bf16.msra.mxu0 %v899_v57 }
  0x8e   : > { %802 = vmatprep.subr.bf16.mxu0 %v1072_v0 }
  0x91   : > { %803 = vmatpush3.bf16.msra.mxu0 %v900_v58 }
  0x92   : > { %804 = vmatprep.subr.bf16.mxu0 %v1072_v0 }
  0x95   : > { %805 = vmatpush3.bf16.msra.mxu0 %v901_v59 }
  0x96   : > { %806 = vmatprep.subr.bf16.mxu0 %v1072_v0  ;;  %v477_v0 = vld [vmem:[#allocation7 + $0x8] sm:$0x7] }
  0x99   : > { %807 = vmatpush3.bf16.msra.mxu0 %v902_v60 }
 0x14e   : > { %v293_v13 = vpop.f32.mrb[0].mxu0 }
 0x14f   : > { %v294_v14 = vadd.f32 %v293_v13, %v230_v12  ;;  %v770_v15 = vpop.f32.mrb[1].mxu0 }
 0x150   : > { %v296_v16 = vpop.f32.mrb[2].mxu0 }
 0x151   : > { %v299_v17 = vmax.f32 %v294_v14, 0.0  ;;  %v771_v18 = vpop.f32.mrb[3].mxu0  ;;  %v482_v14 = vrot.slane %v477_v0, %v1291_v10  ;;  %v588_v10 = vrot.slane %v477_v0, %v1300_v34 }
 0x153   : > { %300 = vadd.xlane.f32.xlu0 %v299_v17  ;;  %v303_v19 = vmul.f32 %v299_v17, %v299_v17 }
 0x157   : > { %304 = vadd.xlane.f32.xlu0 %v303_v19 }
 0x1e0   : > { %v301_v27 = vpop.xlane.xlu0 %300 }
 0x1e1   : > { %v302_v28 = vmul.f32 0.03125, %v301_v27 }
 0x1e3   : > { %v307_v30 = vmul.f32 %v302_v28, %v302_v28  ;;  %v309_v37 = vsub.f32 %v299_v17, %v302_v28 }
 0x1e4   : > { %v305_v29 = vpop.xlane.xlu0 %304 }
 0x1e5   : > { %v306_v31 = vmul.f32 0.03125, %v305_v29 }
 0x1e7   : > { %v308_v32 = vsub.f32 %v306_v31, %v307_v30  ;;  %v593_v31 = vrot.slane %v477_v0, %v1302_v35 }
 0x1e9   : > { %v310_v33 = vadd.f32 1e-05, %v308_v32 }
 0x1eb   : > { %903 = vrsqrt.f32 %v310_v33 }
 0x1f5   : > { %v904_v38 = vpop.eup %903 }
 0x1f6   : > { %v312_v39 = vmul.f32 %v904_v38, %v309_v37 }
 0x1f8   : > { %v317_v41 = vmul.f32 %v316_v36, %v312_v39 }
 0x1fa   : > { %v322_v42 = vadd.f32 %v321_v40, %v317_v41 }
 0x1fc   : > { %v342_v43 = vpack.c.bf16 %v322_v42, %v322_v42 }
 0x1fe   : > { %789 = vmatmul.mubr.bf16.vlgmr.msra.gmra.mrb[0].mxu1 %v342_v43 }
 0x2d1   : > { %v429_v47 = vpop.f32.mrb[0].mxu1 }
 0x2d2   : > { %v430_v48 = vadd.f32 %v429_v47, %v346_v46  ;;  %v790_v49 = vpop.f32.mrb[1].mxu1 }
 0x2d3   : > { %v432_v50 = vpop.f32.mrb[2].mxu1 }
 0x2d4   : > { %v435_v51 = vmax.f32 %v430_v48, 0.0  ;;  %v791_v52 = vpop.f32.mrb[3].mxu1 }
 0x2d6   : > { %436 = vadd.xlane.f32.xlu1 %v435_v51  ;;  %v439_v53 = vmul.f32 %v435_v51, %v435_v51 }
 0x2da   : > { %440 = vadd.xlane.f32.xlu1 %v439_v53 }
 0x363   : > { %v437_v61 = vpop.xlane.xlu1 %436 }
 0x364   : > { %v438_v62 = vmul.f32 0.03125, %v437_v61 }
 0x366   : > { %v443_v1 = vmul.f32 %v438_v62, %v438_v62  ;;  %v445_v6 = vsub.f32 %v435_v51, %v438_v62 }
 0x367   : > { %v441_v63 = vpop.xlane.xlu1 %440 }
 0x368   : > { %v442_v2 = vmul.f32 0.03125, %v441_v63 }
 0x36a   : > { %v444_v3 = vsub.f32 %v442_v2, %v443_v1 }
 0x36c   : > { %v446_v4 = vadd.f32 1e-05, %v444_v3 }
 0x36e   : > { %905 = vrsqrt.f32 %v446_v4 }
 0x378   : > { %v906_v7 = vpop.eup %905 }
 0x379   : > { %v448_v9 = vmul.f32 %v906_v7, %v445_v6 }
 0x37b   : > { %v453_v11 = vmul.f32 %v452_v5, %v448_v9 }
 0x37d   : > { %v458_v12 = vadd.f32 %v457_v8, %v453_v11 }
 0x37f   : > { %v478_v13 = vpack.c.bf16 %v458_v12, %v458_v12 }
 0x381   : > { %809 = vmatmul.mubr.bf16.vlgmr.msra.gmra.mrb[4].mxu0 %v478_v13 }
 0x454   : > { %v565_v15 = vpop.f32.mrb[4].mxu0 }
 0x455   : > { %v566_v16 = vadd.f32 %v565_v15, %v482_v14  ;;  %v810_v17 = vpop.f32.mrb[5].mxu0 }
 0x456   : > { %v568_v18 = vpop.f32.mrb[6].mxu0 }
 0x457   : > { %v571_v19 = vmax.f32 %v566_v16, 0.0  ;;  %v811_v20 = vpop.f32.mrb[7].mxu0 }
 0x459   : > { %572 = vadd.xlane.f32.xlu0 %v571_v19  ;;  %v575_v21 = vmul.f32 %v571_v19, %v571_v19 }
 0x45b   : > { %576 = vadd.xlane.f32.xlu1 %v575_v21 }
 0x4e6   : > { %v573_v22 = vpop.xlane.xlu0 %572 }
 0x4e7   : > { %v574_v23 = vmul.f32 0.03125, %v573_v22 }
 0x4e8   : > { %v577_v24 = vpop.xlane.xlu1 %576 }
 0x4e9   : > { %v579_v25 = vmul.f32 %v574_v23, %v574_v23  ;;  %v578_v26 = vmul.f32 0.03125, %v577_v24  ;;  %v581_v29 = vsub.f32 %v571_v19, %v574_v23 }
 0x4eb   : > { %v580_v27 = vsub.f32 %v578_v26, %v579_v25 }
 0x4ed   : > { %v582_v28 = vadd.f32 1e-05, %v580_v27 }
 0x4ef   : > { %907 = vrsqrt.f32 %v582_v28 }
 0x4f9   : > { %v908_v30 = vpop.eup %907 }
 0x4fa   : > { %v584_v32 = vmul.f32 %v908_v30, %v581_v29 }
 0x4fc   : > { %v589_v33 = vmul.f32 %v588_v10, %v584_v32 }
 0x4fe   : > { %v594_v36 = vadd.f32 %v593_v31, %v589_v33 }
 0x500   : > { %596 = vst.msk [vmem:[%s214_s20] sm:$0xff] %vm595_vm2, %v594_v36 }
 0x501   : > { %1008 = shalt.err (!%p1005_p2)
}
 0x502   : > { %s1009_s10 = scalar_lea.hbm %s1325_s27, 128  ;;  %s1013_s7 = scalar_lea.hbm %s1372_s3, 256 }
 0x503   : > { %p1010_p13 = scmp.ne.s32.totalorder %s1325_s27, %s1009_s10  ;;  %p1014_p4 = scmp.lt.u32.totalorder %s1325_s27, %s1372_s3 }
 0x504   : > { %p1015_p5 = scmp.lt.u32.totalorder %s1013_s7, %s1009_s10  ;;  %p1017_p11 = scmp.lt.u32.totalorder %s1009_s10, %s1325_s27 }
 0x505   : > { %p1011_p6 = pnand %p1010_p13, %p1386_p0 }
 0x506   : > { %p1016_p8 = por %p1015_p5, %p1014_p4 }
 0x507   : > { %p1012_p10 = pneg %p1011_p6 }
 0x508   : > { %p1018_p1 = por %p1017_p11, %p1016_p8 }
 0x50a   : > { %p1019_p3 = pnand %p1018_p1, %p1012_p10 }
 0x50c   : > { %1022 = shalt.err (!%p1019_p3)
}
 0x50d   : > { %822 = dma.vmem_to_hbm [thread:$0]  (%p1386_p0), %s1327_s17, 128, %s1325_s27, %s598_s29  }
 0x50e PF: > { %s623_s28 = sand.u32 1, %s1053_s12   ;;  %p1387_p7 = scmp.ne.s32.totalorder %s1377_s19, 0 }
 0x50f   : > { %p1388_p9 = scmp.ge.s32.totalorder %s1065_s15, 2  ;;  %s624_s22 = scalar_lea.sflag [#allocation4], %s623_s28 }
 0x511   : > { %p836_p12 = pnand %p1388_p9, %p1387_p7 }
 0x513   : > { %1048 = dma.done.wait (!%p836_p12), %s624_s22, 128  }
 0x514   : > { %1050 = vsyncadd (!%p836_p12), %s624_s22, 4294967168  ;;  %p17_p2 = scmp.ge.s32.totalorder %s1205_s4, 4   ;;  %s1389_s12 = smov %s1057_s13 }
 0x515   : > { %s1390_s13 = smov %s1061_s14  ;;  %s1391_s14 = smov %s1221_s9 }
 0x516   : > { %s1392_s15 = smov %s1205_s4  ;;  %19 = sbr.rel (!%p17_p2) target bundleno = 6 (0x6), region = 89 }
 0x51d   :  { %629 = vsyncpa [#allocation3], 1 }
 0x51e   :  { %631 = vsyncpa [#allocation3 + $0x1], 1 }
 0x51f   :  { %632 = vsyncpa [#allocation6], 1 }
 0x520   :  { %633 = vsyncpa [#allocation4], 1 }
 0x521   :  { %635 = vsyncpa [#allocation4 + $0x1], 1 }

</bundles_post_ra>
